<compile_context>
chip_gen: v5e
topology: v5e:2x2
jax: 0.10.0
libtpu: 0.0.40
codegen_flags: <defaults>
</compile_context>

<pallas_src>
import math
from functools import partial

import jax
import jax.numpy as jnp
from jax.experimental import pallas as pl
from jax.experimental.pallas import tpu as pltpu

LN_EPS = 1e-6
VMEM_LIMIT = 64 * 1024 * 1024


def _round_up(x, m):
    return ((x + m - 1) // m) * m


def _ln(x, g, b, eps):
    mu = jnp.mean(x, axis=-1, keepdims=True)
    var = jnp.mean((x - mu) ** 2, axis=-1, keepdims=True)
    return (x - mu) * jax.lax.rsqrt(var + eps) * g + b


# ---------------------------------------------------------------------------
# Kernels
# ---------------------------------------------------------------------------
def patch_embed_kernel(x_ref, w_ref, b_ref, o_ref):
    """o = x @ w + b.  x: (tr, K) bf16, w: (K, D) bf16, b: (1, D) f32."""
    o_ref[...] = (
        jnp.dot(x_ref[...], w_ref[...], preferred_element_type=jnp.float32)
        + b_ref[...]
    )


def attn_block_kernel(x_ref, ln1_g, ln1_b, wqkv, bqkv, wo, bo, o_ref,
                      *, num_heads, eps, valid_len):
    """x1 = x + W_o(MHA(LN1(x))) for one batch element.  Blocks: (1, S, D)."""
    x = x_ref[0]                                    # (S, D), f32
    S, D = x.shape
    H = num_heads
    hd = D // H
    scale = 1.0 / math.sqrt(hd)

    h = _ln(x, ln1_g[...], ln1_b[...], eps)
    # Fused QKV projection: one MXU pass with N = 3D.
    qkv = (jnp.dot(h.astype(jnp.bfloat16), wqkv[...],
                   preferred_element_type=jnp.float32) + bqkv[...])   # (S, 3D)
    q = qkv[:, :D]
    k = qkv[:, D:2 * D]
    v = qkv[:, 2 * D:]

    qh = jnp.swapaxes(q.reshape(S, H, hd), 0, 1).astype(jnp.bfloat16)  # (H,S,hd)
    kh = jnp.swapaxes(k.reshape(S, H, hd), 0, 1).astype(jnp.bfloat16)
    vh = jnp.swapaxes(v.reshape(S, H, hd), 0, 1).astype(jnp.bfloat16)

    s = jnp.einsum('hqd,hkd->hqk', qh, kh,
                   preferred_element_type=jnp.float32) * scale        # (H,S,S)
    if valid_len < S:   # mask padded keys (static condition)
        key_ok = jax.lax.broadcasted_iota(jnp.int32, (1, 1, S), 2) < valid_len
        s = s + jnp.where(key_ok, 0.0, -1e30).astype(jnp.float32)

    s = s - jnp.max(s, axis=-1, keepdims=True)
    p = jnp.exp(s)
    p = p * pl.reciprocal(jnp.sum(p, axis=-1, keepdims=True), approx=True)

    ctx = jnp.einsum('hqk,hkd->hqd', p.astype(jnp.bfloat16), vh,
                     preferred_element_type=jnp.float32)               # (H,S,hd)
    attn = jnp.swapaxes(ctx, 0, 1).reshape(S, D)
    attn = (jnp.dot(attn.astype(jnp.bfloat16), wo[...],
                    preferred_element_type=jnp.float32) + bo[...])

    o_ref[0] = x + attn


def mlp_block_kernel(x_ref, ln2_g, ln2_b, w1, b1, w2, b2, o_ref, *, eps):
    """Row-tiled: o = x + W2(GELU(W1(LN2(x)))).  x block: (tr, D) f32."""
    x = x_ref[...]
    h = _ln(x, ln2_g[...], ln2_b[...], eps)
    m = (jnp.dot(h.astype(jnp.bfloat16), w1[...],
                 preferred_element_type=jnp.float32) + b1[...])
    m = jax.nn.gelu(m, approximate=False)           # nn.GELU default = exact erf
    y = (jnp.dot(m.astype(jnp.bfloat16), w2[...],
                 preferred_element_type=jnp.float32) + b2[...])
    o_ref[...] = x + y


def layernorm_kernel(x_ref, g_ref, b_ref, o_ref, *, eps):
    o_ref[...] = _ln(x_ref[...], g_ref[...], b_ref[...], eps)


# ---------------------------------------------------------------------------
# Wrappers
# ---------------------------------------------------------------------------
def _rowwise_call(kernel, x2d, weights, out_cols, row_tile=256,
                  cost_estimate=None):
    """Run `kernel` over row tiles of x2d; weights are full-block constants."""
    R, C = x2d.shape
    tr = min(row_tile, R)
    Rp = _round_up(R, tr)
    if Rp != R:
        x2d = jnp.pad(x2d, ((0, Rp - R), (0, 0)))

    in_specs = [pl.BlockSpec((tr, C), lambda i: (i, 0))]
    for w in weights:
        in_specs.append(pl.BlockSpec(w.shape, lambda i: (0, 0)))

    out = pl.pallas_call(
        kernel,
        grid=(Rp // tr,),
        out_shape=jax.ShapeDtypeStruct((Rp, out_cols), jnp.float32),
        in_specs=in_specs,
        out_specs=pl.BlockSpec((tr, out_cols), lambda i: (i, 0)),
        compiler_params=pltpu.CompilerParams(
            dimension_semantics=("parallel",),
            vmem_limit_bytes=VMEM_LIMIT),
        cost_estimate=cost_estimate,
    )(x2d, *weights)
    return out[:R] if Rp != R else out


def run_attention_block(x, p, num_heads, valid_len):
    """x: (B, S, D) f32 -> (B, S, D) f32.  Grid over batch."""
    B, S, D = x.shape
    weights = [p["ln1_g"], p["ln1_b"], p["wqkv"], p["bqkv"], p["wo"], p["bo"]]

    in_specs = [pl.BlockSpec((1, S, D), lambda b: (b, 0, 0))]
    for w in weights:
        in_specs.append(pl.BlockSpec(w.shape, lambda b: (0, 0)))

    cost = pl.CostEstimate(
        flops=B * (8 * S * D * D + 4 * S * S * D),
        transcendentals=B * num_heads * S * S,
        bytes_accessed=2 * B * S * D * 4 + 4 * D * D * 2 + 6 * D * 4,
    )
    kernel = partial(attn_block_kernel, num_heads=num_heads, eps=LN_EPS,
                     valid_len=valid_len)
    return pl.pallas_call(
        kernel,
        grid=(B,),
        out_shape=jax.ShapeDtypeStruct((B, S, D), jnp.float32),
        in_specs=in_specs,
        out_specs=pl.BlockSpec((1, S, D), lambda b: (b, 0, 0)),
        compiler_params=pltpu.CompilerParams(
            dimension_semantics=("parallel",),
            vmem_limit_bytes=VMEM_LIMIT),
        cost_estimate=cost,
    )(x, *weights)


# ---------------------------------------------------------------------------
# Parameter construction (deterministic, synthetic — no checkpoint loading)
# ---------------------------------------------------------------------------
def init_params(key, *, patch_size, hidden_dim, mlp_dim, num_layers, seq_length,
                in_channels=3):
    D, M = hidden_dim, mlp_dim
    keys = iter(jax.random.split(key, 2 + num_layers * 4))

    fan_in = in_channels * patch_size * patch_size
    conv_w = jax.random.normal(next(keys), (D, in_channels, patch_size, patch_size),
                               jnp.float32) * math.sqrt(1.0 / fan_in)
    patch_w = conv_w.reshape(D, fan_in).T.astype(jnp.bfloat16)        # (C*p*p, D)
    patch_b = jnp.zeros((1, D), jnp.float32)

    class_token = jnp.zeros((1, 1, D), jnp.float32)
    pos_embedding = jax.random.normal(next(keys), (1, seq_length, D),
                                      jnp.float32) * 0.02

    layers = []
    for _ in range(num_layers):
        layers.append({
            "ln1_g": jnp.ones((1, D), jnp.float32),
            "ln1_b": jnp.zeros((1, D), jnp.float32),
            "wqkv": (jax.random.normal(next(keys), (D, 3 * D), jnp.float32)
                     * 0.02).astype(jnp.bfloat16),
            "bqkv": jnp.zeros((1, 3 * D), jnp.float32),
            "wo": (jax.random.normal(next(keys), (D, D), jnp.float32)
                   * 0.02).astype(jnp.bfloat16),
            "bo": jnp.zeros((1, D), jnp.float32),
            "ln2_g": jnp.ones((1, D), jnp.float32),
            "ln2_b": jnp.zeros((1, D), jnp.float32),
            "w1": (jax.random.normal(next(keys), (D, M), jnp.float32)
                   * 0.02).astype(jnp.bfloat16),
            "b1": jnp.zeros((1, M), jnp.float32),
            "w2": (jax.random.normal(next(keys), (M, D), jnp.float32)
                   * 0.02).astype(jnp.bfloat16),
            "b2": jnp.zeros((1, D), jnp.float32),
        })

    return {
        "patch_w": patch_w, "patch_b": patch_b,
        "class_token": class_token, "pos_embedding": pos_embedding,
        "layers": layers,
        "ln_g": jnp.ones((1, D), jnp.float32),
        "ln_b": jnp.zeros((1, D), jnp.float32),
    }


# ---------------------------------------------------------------------------
# Full forward pass (matches _VisionTransformerBackbone.forward, eval mode,
# dropout = 0, aux_output = False)
# ---------------------------------------------------------------------------
def vit_backbone_forward(x_nchw, params, *, patch_size, num_heads):
    B, C, H, W = x_nchw.shape
    p = patch_size
    n_h, n_w = H // p, W // p
    D = params["patch_w"].shape[1]

    # _process_input: Conv2d(kernel=stride=patch) == patch extraction + matmul.
    x = x_nchw.astype(jnp.float32)
    patches = (
        x.reshape(B, C, n_h, p, n_w, p)
         .transpose(0, 2, 4, 1, 3, 5)               # (B, n_h, n_w, C, p, p)
         .reshape(B * n_h * n_w, C * p * p)
    ).astype(jnp.bfloat16)
    tokens = _rowwise_call(patch_embed_kernel, patches,
                           [params["patch_w"], params["patch_b"]],
                           out_cols=D, row_tile=512)
    tokens = tokens.reshape(B, n_h * n_w, D)

    # prepend class token, add positional embedding (dropout = identity)
    cls = jnp.broadcast_to(params["class_token"], (B, 1, D))
    tokens = jnp.concatenate([cls, tokens], axis=1)                 # (B, S, D)
    tokens = tokens + params["pos_embedding"]

    S_real = tokens.shape[1]
    S_pad = _round_up(S_real, 128) if S_real >= 128 else _round_up(S_real, 8)
    if S_pad != S_real:
        tokens = jnp.pad(tokens, ((0, 0), (0, S_pad - S_real), (0, 0)))

    # encoder layers
    for lp in params["layers"]:
        tokens = run_attention_block(tokens, lp, num_heads, S_real)
        M_dim = lp["w1"].shape[1]
        R = B * S_pad
        mlp_cost = pl.CostEstimate(
            flops=4 * R * D * M_dim,
            transcendentals=R * M_dim,
            bytes_accessed=2 * R * D * 4 + 2 * D * M_dim * 2 + (M_dim + 3 * D) * 4)
        flat = _rowwise_call(partial(mlp_block_kernel, eps=LN_EPS),
                             tokens.reshape(R, D),
                             [lp["ln2_g"], lp["ln2_b"], lp["w1"], lp["b1"],
                              lp["w2"], lp["b2"]],
                             out_cols=D, row_tile=256, cost_estimate=mlp_cost)
        tokens = flat.reshape(B, S_pad, D)

    # final LayerNorm (row-tiled)
    flat = _rowwise_call(partial(layernorm_kernel, eps=LN_EPS),
                         tokens.reshape(B * S_pad, D),
                         [params["ln_g"], params["ln_b"]],
                         out_cols=D, row_tile=512)
    tokens = flat.reshape(B, S_pad, D)

    # drop class token + padding, reshape to NCHW feature map
    feats = tokens[:, 1:S_real]                                     # (B, n_p, D)
    feats = feats.reshape(B, n_h, n_w, D).transpose(0, 3, 1, 2)     # (B, D, h, w)
    return feats


# ---------------------------------------------------------------------------
if __name__ == "__main__":
    # Small ViT config: image 16x16, patch 4, 2 layers, 2 heads, hidden 32, mlp 64.
    image_size = 16
    patch_size = 4
    num_layers = 2
    num_heads = 2
    hidden_dim = 32
    mlp_dim = 64
    batch = 2
    in_channels = 3                      # conv_proj expects 3 input channels

    n_patches = (image_size // patch_size) ** 2
    seq_length = n_patches + 1

    key = jax.random.PRNGKey(0)
    key_x, key_p = jax.random.split(key)

    params = init_params(
        key_p,
        patch_size=patch_size,
        hidden_dim=hidden_dim,
        mlp_dim=mlp_dim,
        num_layers=num_layers,
        seq_length=seq_length,
        in_channels=in_channels,
    )

    x = jax.random.normal(key_x, (batch, in_channels, image_size, image_size),
                          jnp.float32)

    out = vit_backbone_forward(x, params, patch_size=patch_size,
                               num_heads=num_heads)
    out = jax.block_until_ready(out)

    expected_shape = (batch, hidden_dim, image_size // patch_size,
                      image_size // patch_size)
    assert out.shape == expected_shape, (out.shape, expected_shape)
    assert jnp.all(jnp.isfinite(out))
    print("KERNEL_OK")
</pallas_src>

<mosaic_0001>
module attributes {stable_mosaic.version = 11 : i64} {
  func.func @patch_embed_kernel(%arg0: i32, %arg1: memref<32x48xbf16, #tpu.memory_space<vmem>>, %arg2: memref<48x32xbf16, #tpu.memory_space<vmem>>, %arg3: memref<1x32xf32, #tpu.memory_space<vmem>>, %arg4: memref<32x32xf32, #tpu.memory_space<vmem>>) attributes {dimension_semantics = [#tpu.dimension_semantics<parallel>], iteration_bounds = array<i64: 1>, scalar_prefetch = 0 : i64, scratch_operands = 0 : i64, tpu.core_type = #tpu.core_type<tc>, window_params = [{transform_indices = @transform_0, window_bounds = array<i64: 32, 48>}, {pipeline_mode = #tpu.pipeline_mode<synchronous>, transform_indices = @transform_1, window_bounds = array<i64: 48, 32>}, {pipeline_mode = #tpu.pipeline_mode<synchronous>, transform_indices = @transform_2, window_bounds = array<i64: 1, 32>}, {transform_indices = @transform_3, window_bounds = array<i64: 32, 32>}]} {
    %c0 = arith.constant 0 : index
    %c0_0 = arith.constant 0 : index
    %0 = vector.load %arg1[%c0, %c0_0] : memref<32x48xbf16, #tpu.memory_space<vmem>>, vector<32x48xbf16>
    %c0_1 = arith.constant 0 : index
    %c0_2 = arith.constant 0 : index
    %1 = vector.load %arg2[%c0_1, %c0_2] : memref<48x32xbf16, #tpu.memory_space<vmem>>, vector<48x32xbf16>
    %cst = arith.constant dense<0.000000e+00> : vector<32x32xf32>
    %2 = tpu.matmul %0, %1, %cst {dimension_numbers = #tpu.dot_dimension_numbers<[1], [0], [0], [1], [0, 0, 1, 1], [], []>} : vector<32x48xbf16>, vector<48x32xbf16>, vector<32x32xf32> -> vector<32x32xf32>
    %c0_3 = arith.constant 0 : index
    %c0_4 = arith.constant 0 : index
    %3 = vector.load %arg3[%c0_3, %c0_4] : memref<1x32xf32, #tpu.memory_space<vmem>>, vector<1x32xf32>
    %4 = vector.broadcast %3 : vector<1x32xf32> to vector<32x32xf32>
    %5 = arith.addf %2, %4 : vector<32x32xf32>
    %c0_5 = arith.constant 0 : index
    %c0_6 = arith.constant 0 : index
    %6 = vector.load %arg4[%c0_5, %c0_6] : memref<32x32xf32, #tpu.memory_space<vmem>>, vector<32x32xf32>
    tpu.vector_store %arg4[%c0_5, %c0_6], %5 {strides = array<i32>} : memref<32x32xf32, #tpu.memory_space<vmem>>, vector<32x32xf32>,
    return
  }
  func.func @transform_0(%arg0: i32) -> (i32, i32) {
    %c0_i32 = arith.constant 0 : i32
    %c0_i32_0 = arith.constant 0 : i32
    return %arg0, %c0_i32 : i32, i32
  }
  func.func @transform_1(%arg0: i32) -> (i32, i32) {
    %c0_i32 = arith.constant 0 : i32
    %c0_i32_0 = arith.constant 0 : i32
    %c0_i32_1 = arith.constant 0 : i32
    return %c0_i32, %c0_i32_0 : i32, i32
  }
  func.func @transform_2(%arg0: i32) -> (i32, i32) {
    %c0_i32 = arith.constant 0 : i32
    %c0_i32_0 = arith.constant 0 : i32
    %c0_i32_1 = arith.constant 0 : i32
    return %c0_i32, %c0_i32_0 : i32, i32
  }
  func.func @transform_3(%arg0: i32) -> (i32, i32) {
    %c0_i32 = arith.constant 0 : i32
    %c0_i32_0 = arith.constant 0 : i32
    return %arg0, %c0_i32 : i32, i32
  }
}

</mosaic_0001>

<bundles_post_ra>
// kernel: tpu_custom_call.1
= control target key start
LH: loop header
LB: loop body
LE: loop exit
PB: predicated region body
PF: predicated region fallthrough
CT: control target
= control target key end

     0   :  { %s215_s0 = inlined_call_operand.vmem [shape: bf16[32,48], index: 0, kind: input, shape index: {}]   ;;  %s216_s1 = inlined_call_operand.vmem [shape: bf16[48,32], index: 1, kind: input, shape index: {}]   ;;  %s217_s2 = inlined_call_operand.vmem [shape: f32[1,32], index: 2, kind: input, shape index: {}]   ;;  %s218_s3 = inlined_call_operand.hbm [shape: f32[32,32], index: 3, kind: output, shape index: {}]  }
   0x1   :  { %v133_v0 = vld [vmem:[%s216_s1 + $0x10] sm:$0xff]  ;;  %v132_v1 = vld [vmem:[%s216_s1 + $0x8] sm:$0xff] }
   0x2   :  { %70 = vmatpush.bf16.msra.mxu0 %v133_v0  ;;  %134 = vmatpush.bf16.msra.mxu1 %v133_v0 }
   0x3   :  { %8 = vsyncpa [#allocation3], 0  ;;  %v131_v2 = vld [vmem:[%s216_s1] sm:$0xff]  ;;  %v130_v4 = vld [vmem:[%s215_s0 + $0x8] sm:$0xff]  ;;  %vm58_vm0 = vcmask 392192   ;;  %vm84_vm1 = vcmask 261120  }
   0x4   :  { %v129_v3 = vld [vmem:[%s215_s0] sm:$0xff]  ;;  %s167_s1 = smov [#allocation2]   ;;  %s95_s26 = sshll.u32 %s218_s3, 4  ;;  %s96_s26 = int_to_ptr.hbm [resolvable:$true] %s95_s26 }
   0x5   :  { %v140_v5 = vld [vmem:[%s217_s2] ss:$0 sm:$0xff]  ;;  %s93_s0 = sshll.u32 %s167_s1, 4  ;;  %s168_s2 = smov 128   ;;  %s94_s0 = int_to_ptr.vmem [resolvable:$true] %s93_s0 }
   0x6   :  { %71 = vmatpush.bf16.msra.mxu0 %v132_v1  ;;  %135 = vmatpush.bf16.msra.mxu1 %v132_v1  ;;  %s169_s27 = smov 8  }
   0xa   :  { %72 = vmatpush.bf16.msra.mxu0 %v131_v2  ;;  %136 = vmatpush.bf16.msra.mxu1 %v131_v2 }
   0xd   :  { %127 = vmatmul.msk.bf16.vlgmr.msra.gmra.mxu0 %vm58_vm0, %v129_v3  ;;  %128 = vmatmul.msk.bf16.vlgmr.msra.gmra.mxu1 %vm58_vm0, %v130_v4 }
  0x8a   :  { %v74_v6 = vpop.f32.mrf.mxu0  ;;  %v79_v7 = vpop.f32.mrf.mxu1 }
  0x8b   :  { %v75_v8 = vadd.f32 %v140_v5, %v74_v6  ;;  %v80_v9 = vadd.f32 %v140_v5, %v79_v7 }
  0x8d   :  { %85 = vst.msk [vmem:[#allocation2] sm:$0xff] %vm84_vm1, %v75_v8 }
  0x8e   :  { %87 = vst.msk [vmem:[#allocation2 + $0x10] sm:$0xff] %vm84_vm1, %v80_v9 }
  0x92   :  { %v76_v10 = vpop.f32.mrf.mxu0  ;;  %v81_v11 = vpop.f32.mrf.mxu1 }
  0x93   :  { %v77_v12 = vadd.f32 %v140_v5, %v76_v10  ;;  %v82_v13 = vadd.f32 %v140_v5, %v81_v11 }
  0x95   :  { %86 = vst.msk [vmem:[#allocation2 + $0x8] sm:$0xff] %vm84_vm1, %v77_v12 }
  0x96   :  { %88 = vst.msk [vmem:[#allocation2 + $0x18] sm:$0xff] %vm84_vm1, %v82_v13 }
  0x97   :  { %101 = dma.vmem_to_hbm [thread:$0]  %s94_s0, 512, %s96_s26, [#allocation3], %s168_s2, %s168_s2, %s169_s27  }
  0x98   :  { %165 = dma.done.wait [#allocation3], 512  }
  0x99   :  { %166 = vsyncadd [#allocation3], 4294966784 }
  0x9a   :  { %106 = vsyncpa [#allocation3], 1 }

</bundles_post_ra>
